<compile_context>
chip_gen: v5e
topology: v5e:2x2
jax: 0.10.0
libtpu: 0.0.40
codegen_flags: <defaults>
</compile_context>

<pallas_src>
import functools
import math

import jax
import jax.numpy as jnp
from jax.experimental import pallas as pl
from jax.experimental.pallas import tpu as pltpu

_NEG_INF = -1e30


def _round_up(x, m):
    return ((x + m - 1) // m) * m


def _cdiv(a, b):
    return (a + b - 1) // b


# ----------------------------- kernel bodies ---------------------------------

def _backbone(x_ref, w1_ref, b1_ref, w2_ref, b2_ref):
    """relu(fc2(relu(fc1(x)))) on one (bm, K) tile.  f32 MXU accumulation."""
    h1 = jnp.dot(x_ref[...], w1_ref[...], preferred_element_type=jnp.float32)
    h1 = jnp.maximum(h1 + b1_ref[...], 0.0)
    h2 = jnp.dot(h1.astype(w2_ref.dtype), w2_ref[...],
                 preferred_element_type=jnp.float32)
    return jnp.maximum(h2 + b2_ref[...], 0.0)


def _heads(h2, wpv_ref, bpv_ref, num_actions):
    """Fused policy + value heads in a single matmul.

    wpv lanes [0, A) = policy weights, lane A = value weights, rest zero.
    Returns a (bm, A_pad) slab: softmax probs in lanes [0, A), the value in
    lane A, exact zeros elsewhere.
    """
    logits = jnp.dot(h2.astype(wpv_ref.dtype), wpv_ref[...],
                     preferred_element_type=jnp.float32) + bpv_ref[...]
    col = jax.lax.broadcasted_iota(jnp.int32, logits.shape, 1)
    masked = jnp.where(col >= num_actions, _NEG_INF, logits)
    m = jnp.max(masked, axis=-1, keepdims=True)
    e = jnp.exp(masked - m)                       # padded lanes underflow to 0
    inv = pl.reciprocal(jnp.sum(e, axis=-1, keepdims=True), approx=False)
    probs = e * inv
    # Re-insert the (unmasked) value into lane A.
    return probs + jnp.where(col == num_actions, logits, 0.0)


def _kernel_hidden(x_ref, w1_ref, b1_ref, w2_ref, b2_ref, h_ref):
    h2 = _backbone(x_ref, w1_ref, b1_ref, w2_ref, b2_ref)
    h_ref[...] = h2.astype(h_ref.dtype)


def _kernel_heads(num_actions, x_ref, w1_ref, b1_ref, w2_ref, b2_ref,
                  wpv_ref, bpv_ref, pv_ref):
    h2 = _backbone(x_ref, w1_ref, b1_ref, w2_ref, b2_ref)
    pv_ref[...] = _heads(h2, wpv_ref, bpv_ref, num_actions).astype(pv_ref.dtype)


def _kernel_all(num_actions, x_ref, w1_ref, b1_ref, w2_ref, b2_ref,
                wpv_ref, bpv_ref, h_ref, pv_ref):
    h2 = _backbone(x_ref, w1_ref, b1_ref, w2_ref, b2_ref)
    h_ref[...] = h2.astype(h_ref.dtype)
    pv_ref[...] = _heads(h2, wpv_ref, bpv_ref, num_actions).astype(pv_ref.dtype)


# ------------------------------- wrapper --------------------------------------

def _run(x, w1, b1, w2, b2, wp=None, bp=None, wv=None, bv=None, *,
         want_hidden, want_heads, block_m=1024,
         compute_dtype=jnp.float32, out_dtype=jnp.float32):
    B, K = x.shape
    H = w1.shape[1]
    cdt = jnp.dtype(compute_dtype)
    odt = jnp.dtype(out_dtype)

    # Batch tile.  For B > 16 keep >= 2 grid steps (v7x megacore sharding);
    # for tiny batches a single block equal to the full batch dim is always
    # a legal block shape.
    if B > 16:
        bm = min(block_m, _round_up(_cdiv(B, 2), 8))
    else:
        bm = B
    grid = (_cdiv(B, bm),)

    row = lambda i: (i, 0)          # batch-tiled operands
    rep = lambda i: (0, 0)          # VMEM-resident weights/biases (DMA'd once)

    # No zero-padded copy of x: partial final tile is handled by Pallas
    # (garbage pad rows never reach HBM because output writes are masked).
    inputs = [
        x.astype(cdt),
        w1.astype(cdt),
        jnp.asarray(b1, jnp.float32).reshape(1, H),
        w2.astype(cdt),
        jnp.asarray(b2, jnp.float32).reshape(1, H),
    ]
    in_specs = [
        pl.BlockSpec((bm, K), row),
        pl.BlockSpec((K, H), rep),
        pl.BlockSpec((1, H), rep),
        pl.BlockSpec((H, H), rep),
        pl.BlockSpec((1, H), rep),
    ]
    # TODO(synk): mark the constant-index weight specs pipeline_mode=pl.Buffered(1)
    # (single-buffered) once supported by the installed jax; minor VMEM hygiene.

    out_shape = []
    out_specs = []
    if want_hidden:
        out_shape.append(jax.ShapeDtypeStruct((B, H), odt))
        out_specs.append(pl.BlockSpec((bm, H), row))

    num_actions = 0
    if want_heads:
        num_actions = wp.shape[1]
        A_pad = _round_up(num_actions + 1, 128)   # lane `num_actions` = value
        wpv = jnp.zeros((H, A_pad), cdt)
        wpv = wpv.at[:, :num_actions].set(wp.astype(cdt))
        wpv = wpv.at[:, num_actions].set(jnp.asarray(wv, cdt).reshape(H))
        bpv = jnp.zeros((1, A_pad), jnp.float32)
        bpv = bpv.at[:, :num_actions].set(
            jnp.asarray(bp, jnp.float32).reshape(1, num_actions))
        bpv = bpv.at[:, num_actions].set(jnp.asarray(bv, jnp.float32).reshape(()))
        inputs += [wpv, bpv]
        in_specs += [pl.BlockSpec((H, A_pad), rep),
                     pl.BlockSpec((1, A_pad), rep)]
        out_shape.append(jax.ShapeDtypeStruct((B, A_pad), odt))
        out_specs.append(pl.BlockSpec((bm, A_pad), row))

    if want_hidden and want_heads:
        kernel = functools.partial(_kernel_all, num_actions)
    elif want_heads:
        kernel = functools.partial(_kernel_heads, num_actions)
    else:
        kernel = _kernel_hidden

    return pl.pallas_call(
        kernel,
        grid=grid,
        out_shape=tuple(out_shape) if len(out_shape) > 1 else out_shape[0],
        in_specs=in_specs,
        out_specs=tuple(out_specs) if len(out_specs) > 1 else out_specs[0],
        compiler_params=pltpu.CompilerParams(
            dimension_semantics=("parallel",),    # v7x: shard batch over 2 TCs
        ),
    )(*inputs)


# ------------------------------ public API ------------------------------------

def ppo_forward(x, w1, b1, w2, b2, **kw):
    """PPOActorCritic.forward(x) -> hidden (B, 128).  Writes only `hidden`."""
    return _run(x, w1, b1, w2, b2, want_hidden=True, want_heads=False, **kw)


def ppo_policy_value(x, w1, b1, w2, b2, wp, bp, wv, bv, *,
                     return_padded=False, **kw):
    """(policy probs (B, A), value (B, 1)).  Skips the hidden writeback."""
    A = wp.shape[1]
    pv = _run(x, w1, b1, w2, b2, wp, bp, wv, bv,
              want_hidden=False, want_heads=True, **kw)
    if return_padded:
        return pv                               # lanes [0,A)=probs, lane A=value
    return pv[:, :A], pv[:, A:A + 1]


def ppo_policy(x, w1, b1, w2, b2, wp, bp, wv, bv, **kw):
    return ppo_policy_value(x, w1, b1, w2, b2, wp, bp, wv, bv, **kw)[0]


def ppo_value(x, w1, b1, w2, b2, wp, bp, wv, bv, **kw):
    return ppo_policy_value(x, w1, b1, w2, b2, wp, bp, wv, bv, **kw)[1]


def ppo_forward_policy_value(x, w1, b1, w2, b2, wp, bp, wv, bv, *,
                             return_padded=False, **kw):
    """(hidden, probs, value) from a single fused kernel launch."""
    A = wp.shape[1]
    hidden, pv = _run(x, w1, b1, w2, b2, wp, bp, wv, bv,
                      want_hidden=True, want_heads=True, **kw)
    if return_padded:
        return hidden, pv
    return hidden, pv[:, :A], pv[:, A:A + 1]


def init_linear(key, fan_in, fan_out):
    """PyTorch nn.Linear-style init; W stored (in, out), bias (1, out)."""
    kw_, kb_ = jax.random.split(key)
    bound = 1.0 / math.sqrt(fan_in)
    w = jax.random.uniform(kw_, (fan_in, fan_out), jnp.float32, -bound, bound)
    b = jax.random.uniform(kb_, (1, fan_out), jnp.float32, -bound, bound)
    return w, b


if __name__ == "__main__":
    state_dim = 32
    hidden_dim = 128
    num_actions = 4
    batch = 2

    root = jax.random.PRNGKey(0)
    kx, k1, k2, k3, k4 = jax.random.split(root, 5)

    x = jax.random.normal(kx, (batch, state_dim), jnp.float32)
    w1, b1 = init_linear(k1, state_dim, hidden_dim)
    w2, b2 = init_linear(k2, hidden_dim, hidden_dim)
    wp, bp = init_linear(k3, hidden_dim, num_actions)
    wv, bv = init_linear(k4, hidden_dim, 1)

    # forward() only (hidden-only kernel), combined kernel, and heads-only kernel.
    h = ppo_forward(x, w1, b1, w2, b2)
    h2, probs, val = ppo_forward_policy_value(x, w1, b1, w2, b2, wp, bp, wv, bv)
    probs2, val2 = ppo_policy_value(x, w1, b1, w2, b2, wp, bp, wv, bv)
    jax.block_until_ready((h, h2, probs, val, probs2, val2))

    # Pure-JAX reference (same math, outside Pallas).
    h_ref = jnp.maximum(x @ w1 + b1, 0.0)
    h_ref = jnp.maximum(h_ref @ w2 + b2, 0.0)
    probs_ref = jax.nn.softmax(h_ref @ wp + bp, axis=-1)
    val_ref = h_ref @ wv + bv

    assert h.shape == (batch, hidden_dim)
    assert probs.shape == (batch, num_actions)
    assert val.shape == (batch, 1)
    assert jnp.allclose(h, h_ref, atol=1e-4, rtol=1e-4)
    assert jnp.allclose(h2, h_ref, atol=1e-4, rtol=1e-4)
    assert jnp.allclose(probs, probs_ref, atol=1e-5, rtol=1e-4)
    assert jnp.allclose(val, val_ref, atol=1e-4, rtol=1e-4)
    assert jnp.allclose(probs2, probs_ref, atol=1e-5, rtol=1e-4)
    assert jnp.allclose(val2, val_ref, atol=1e-4, rtol=1e-4)

    print("KERNEL_OK")
</pallas_src>

<mosaic_0001>
module attributes {stable_mosaic.version = 11 : i64} {
  func.func @_kernel_hidden(%arg0: i32, %arg1: memref<2x32xf32, #tpu.memory_space<vmem>>, %arg2: memref<32x128xf32, #tpu.memory_space<vmem>>, %arg3: memref<1x128xf32, #tpu.memory_space<vmem>>, %arg4: memref<128x128xf32, #tpu.memory_space<vmem>>, %arg5: memref<1x128xf32, #tpu.memory_space<vmem>>, %arg6: memref<2x128xf32, #tpu.memory_space<vmem>>) attributes {dimension_semantics = [#tpu.dimension_semantics<parallel>], iteration_bounds = array<i64: 1>, scalar_prefetch = 0 : i64, scratch_operands = 0 : i64, tpu.core_type = #tpu.core_type<tc>, window_params = [{transform_indices = @transform_0, window_bounds = array<i64: 2, 32>}, {pipeline_mode = #tpu.pipeline_mode<synchronous>, transform_indices = @transform_1, window_bounds = array<i64: 32, 128>}, {pipeline_mode = #tpu.pipeline_mode<synchronous>, transform_indices = @transform_2, window_bounds = array<i64: 1, 128>}, {pipeline_mode = #tpu.pipeline_mode<synchronous>, transform_indices = @transform_3, window_bounds = array<i64: 128, 128>}, {pipeline_mode = #tpu.pipeline_mode<synchronous>, transform_indices = @transform_4, window_bounds = array<i64: 1, 128>}, {transform_indices = @transform_5, window_bounds = array<i64: 2, 128>}]} {
    %c0 = arith.constant 0 : index
    %c0_0 = arith.constant 0 : index
    %0 = vector.load %arg1[%c0, %c0_0] : memref<2x32xf32, #tpu.memory_space<vmem>>, vector<2x32xf32>
    %c0_1 = arith.constant 0 : index
    %c0_2 = arith.constant 0 : index
    %1 = vector.load %arg2[%c0_1, %c0_2] : memref<32x128xf32, #tpu.memory_space<vmem>>, vector<32x128xf32>
    %cst = arith.constant dense<0.000000e+00> : vector<2x128xf32>
    %2 = tpu.matmul %0, %1, %cst {dimension_numbers = #tpu.dot_dimension_numbers<[1], [0], [0], [1], [0, 0, 1, 1], [], []>} : vector<2x32xf32>, vector<32x128xf32>, vector<2x128xf32> -> vector<2x128xf32>
    %c0_3 = arith.constant 0 : index
    %c0_4 = arith.constant 0 : index
    %3 = vector.load %arg3[%c0_3, %c0_4] : memref<1x128xf32, #tpu.memory_space<vmem>>, vector<1x128xf32>
    %4 = vector.broadcast %3 : vector<1x128xf32> to vector<2x128xf32>
    %5 = arith.addf %2, %4 : vector<2x128xf32>
    %cst_5 = arith.constant 0.000000e+00 : f32
    %6 = vector.broadcast %cst_5 : f32 to vector<2x128xf32>
    %7 = arith.maximumf %5, %6 : vector<2x128xf32>
    %c0_6 = arith.constant 0 : index
    %c0_7 = arith.constant 0 : index
    %8 = vector.load %arg4[%c0_6, %c0_7] : memref<128x128xf32, #tpu.memory_space<vmem>>, vector<128x128xf32>
    %cst_8 = arith.constant dense<0.000000e+00> : vector<2x128xf32>
    %9 = tpu.matmul %7, %8, %cst_8 {dimension_numbers = #tpu.dot_dimension_numbers<[1], [0], [0], [1], [0, 0, 1, 1], [], []>} : vector<2x128xf32>, vector<128x128xf32>, vector<2x128xf32> -> vector<2x128xf32>
    %c0_9 = arith.constant 0 : index
    %c0_10 = arith.constant 0 : index
    %10 = vector.load %arg5[%c0_9, %c0_10] : memref<1x128xf32, #tpu.memory_space<vmem>>, vector<1x128xf32>
    %11 = vector.broadcast %10 : vector<1x128xf32> to vector<2x128xf32>
    %12 = arith.addf %9, %11 : vector<2x128xf32>
    %cst_11 = arith.constant 0.000000e+00 : f32
    %13 = vector.broadcast %cst_11 : f32 to vector<2x128xf32>
    %14 = arith.maximumf %12, %13 : vector<2x128xf32>
    %c0_12 = arith.constant 0 : index
    %c0_13 = arith.constant 0 : index
    %15 = vector.load %arg6[%c0_12, %c0_13] : memref<2x128xf32, #tpu.memory_space<vmem>>, vector<2x128xf32>
    tpu.vector_store %arg6[%c0_12, %c0_13], %14 {strides = array<i32>} : memref<2x128xf32, #tpu.memory_space<vmem>>, vector<2x128xf32>,
    return
  }
  func.func @transform_0(%arg0: i32) -> (i32, i32) {
    %c0_i32 = arith.constant 0 : i32
    %c0_i32_0 = arith.constant 0 : i32
    return %arg0, %c0_i32 : i32, i32
  }
  func.func @transform_1(%arg0: i32) -> (i32, i32) {
    %c0_i32 = arith.constant 0 : i32
    %c0_i32_0 = arith.constant 0 : i32
    %c0_i32_1 = arith.constant 0 : i32
    return %c0_i32, %c0_i32_0 : i32, i32
  }
  func.func @transform_2(%arg0: i32) -> (i32, i32) {
    %c0_i32 = arith.constant 0 : i32
    %c0_i32_0 = arith.constant 0 : i32
    %c0_i32_1 = arith.constant 0 : i32
    return %c0_i32, %c0_i32_0 : i32, i32
  }
  func.func @transform_3(%arg0: i32) -> (i32, i32) {
    %c0_i32 = arith.constant 0 : i32
    %c0_i32_0 = arith.constant 0 : i32
    %c0_i32_1 = arith.constant 0 : i32
    return %c0_i32, %c0_i32_0 : i32, i32
  }
  func.func @transform_4(%arg0: i32) -> (i32, i32) {
    %c0_i32 = arith.constant 0 : i32
    %c0_i32_0 = arith.constant 0 : i32
    %c0_i32_1 = arith.constant 0 : i32
    return %c0_i32, %c0_i32_0 : i32, i32
  }
  func.func @transform_5(%arg0: i32) -> (i32, i32) {
    %c0_i32 = arith.constant 0 : i32
    %c0_i32_0 = arith.constant 0 : i32
    return %arg0, %c0_i32 : i32, i32
  }
}

</mosaic_0001>

<bundles_post_ra>
// kernel: tpu_custom_call.1
= control target key start
LH: loop header
LB: loop body
LE: loop exit
PB: predicated region body
PF: predicated region fallthrough
CT: control target
= control target key end

     0   :  { %10 = vsyncpa [#allocation3], 0  ;;  %s325_s0 = inlined_call_operand.hbm [shape: f32[2,32], index: 0, kind: input, shape index: {}]   ;;  %s326_s1 = inlined_call_operand.hbm [shape: f32[32,128], index: 1, kind: input, shape index: {}]   ;;  %s327_s2 = inlined_call_operand.vmem [shape: f32[1,128], index: 2, kind: input, shape index: {}]   ;;  %s328_s3 = inlined_call_operand.hbm [shape: f32[128,128], index: 3, kind: input, shape index: {}]   ;;  %s329_s4 = inlined_call_operand.vmem [shape: f32[1,128], index: 4, kind: input, shape index: {}]   ;;  %s330_s5 = inlined_call_operand.hbm [shape: f32[2,128], index: 5, kind: output, shape index: {}]  }
   0x1   :  { %11 = vsyncpa [#allocation6], 0  ;;  %s28_s20 = sshll.u32 %s326_s1, 4  ;;  %s29_s20 = int_to_ptr.hbm [resolvable:$true] %s28_s20 }
   0x2   :  { %12 = vsyncpa [#allocation4], 0  ;;  %s271_s21 = smov [#allocation5]   ;;  %s18_s25 = sshll.u32 %s325_s0, 4  ;;  %s19_s25 = int_to_ptr.hbm [resolvable:$true] %s18_s25 }
   0x3   :  { %s30_s22 = sshll.u32 %s271_s21, 4  ;;  %s272_s26 = smov 128   ;;  %s31_s22 = int_to_ptr.vmem [resolvable:$true] %s30_s22 }
   0x4   :  { %s273_s27 = smov 8   ;;  %s274_s28 = smov [#allocation2]  }
   0x5   :  { %36 = dma.hbm_to_vmem [thread:$0]  %s29_s20, 512, %s31_s22, [#allocation6], %s272_s26, %s272_s26, %s273_s27  }
   0x6   :  { %s20_s29 = sshll.u32 %s274_s28, 4  ;;  %s43_s7 = sshll.u32 %s328_s3, 4  ;;  %s21_s29 = int_to_ptr.vmem [resolvable:$true] %s20_s29  ;;  %s44_s7 = int_to_ptr.hbm [resolvable:$true] %s43_s7 }
   0x7   :  { %23 = dma.hbm_to_vmem [thread:$0]  %s19_s25, 32, %s21_s29, [#allocation3]  }
   0x8   :  { %s275_s1 = smov [#allocation7]  }
   0x9   :  { %s45_s8 = sshll.u32 %s275_s1, 4  ;;  %s46_s8 = int_to_ptr.vmem [resolvable:$true] %s45_s8 }
   0xa   :  { %51 = dma.hbm_to_vmem [thread:$0]  %s44_s7, 2048, %s46_s8, [#allocation6], %s272_s26, %s272_s26, %s273_s27  }
   0xb   :  { %265 = dma.done.wait [#allocation3], 32  }
   0xc   :  { %266 = vsyncadd [#allocation3], 4294967264 }
   0xd   :  { %267 = dma.done.wait [#allocation6], 2560  }
   0xe   :  { %268 = vsyncadd [#allocation6], 4294964736  ;;  %v70_v0 = vld [vmem:[#allocation5 + $0x18] sm:$0xff]  ;;  %v69_v1 = vld [vmem:[#allocation5 + $0x10] sm:$0xff]  ;;  %vm75_vm0 = vcmask 261120   ;;  %s276_s11 = smov [#allocation8]  }
   0xf   :  { %91 = vmatpush.msra.mxu0 %v70_v0  ;;  %v115_v2 = vld [vmem:[#allocation7 + $0x78] sm:$0xff]  ;;  %v68_v3 = vld [vmem:[#allocation5 + $0x8] sm:$0xff]  ;;  %v114_v4 = vld [vmem:[#allocation7 + $0x70] sm:$0xff]  ;;  %s147_s12 = sshll.u32 %s276_s11, 4  ;;  %s149_s15 = sshll.u32 %s330_s5, 4  ;;  %s148_s12 = int_to_ptr.vmem [resolvable:$true] %s147_s12  ;;  %s150_s15 = int_to_ptr.hbm [resolvable:$true] %s149_s15 }
  0x10   :  { %120 = vmatpush.msra.mxu1 %v115_v2  ;;  %v113_v5 = vld [vmem:[#allocation7 + $0x68] sm:$0xff]  ;;  %v67_v6 = vld [vmem:[#allocation5] sm:$0xff]  ;;  %v66_v7 = vld [vmem:[#allocation2] sm:$0x3] }
  0x11   :  { %92 = vmatpush.msra.mxu0 %v69_v1  ;;  %v112_v8 = vld [vmem:[#allocation7 + $0x60] sm:$0xff]  ;;  %v111_v9 = vld [vmem:[#allocation7 + $0x58] sm:$0xff]  ;;  %v110_v10 = vld [vmem:[#allocation7 + $0x50] sm:$0xff] }
  0x12   :  { %121 = vmatpush.msra.mxu1 %v114_v4  ;;  %v109_v11 = vld [vmem:[#allocation7 + $0x48] sm:$0xff]  ;;  %v108_v12 = vld [vmem:[#allocation7 + $0x40] sm:$0xff]  ;;  %v107_v13 = vld [vmem:[#allocation7 + $0x38] sm:$0xff] }
  0x13   :  { %93 = vmatpush.msra.mxu0 %v68_v3  ;;  %v106_v14 = vld [vmem:[#allocation7 + $0x30] sm:$0xff]  ;;  %v105_v15 = vld [vmem:[#allocation7 + $0x28] sm:$0xff]  ;;  %v104_v16 = vld [vmem:[#allocation7 + $0x20] sm:$0xff] }
  0x14   :  { %122 = vmatpush.msra.mxu1 %v113_v5  ;;  %v103_v17 = vld [vmem:[#allocation7 + $0x18] sm:$0xff]  ;;  %v102_v18 = vld [vmem:[#allocation7 + $0x10] sm:$0xff]  ;;  %v101_v19 = vld [vmem:[#allocation7 + $0x8] sm:$0xff] }
  0x15   :  { %94 = vmatpush.msra.mxu0 %v67_v6  ;;  %v100_v20 = vld [vmem:[#allocation7] sm:$0xff]  ;;  %v167_v21 = vld [vmem:[%s327_s2] ss:$0 sm:$0xff] }
  0x16   :  { %160 = vmatmul.msk.f32.vlgmr.msra.gmra.mxu0 %vm75_vm0, %v66_v7  ;;  %123 = vmatpush.msra.mxu1 %v112_v8  ;;  %v168_v25 = vld [vmem:[%s329_s4] ss:$0 sm:$0xff] }
  0x18   :  { %124 = vmatpush.msra.mxu1 %v111_v9 }
  0x1a   :  { %125 = vmatpush.msra.mxu1 %v110_v10 }
  0x1c   :  { %126 = vmatpush.msra.mxu1 %v109_v11 }
  0x1e   :  { %127 = vmatpush.msra.mxu1 %v108_v12 }
  0x20   :  { %128 = vmatpush.msra.mxu1 %v107_v13 }
  0x22   :  { %129 = vmatpush.msra.mxu1 %v106_v14 }
  0x24   :  { %130 = vmatpush.msra.mxu1 %v105_v15 }
  0x26   :  { %131 = vmatpush.msra.mxu1 %v104_v16 }
  0x28   :  { %132 = vmatpush.msra.mxu1 %v103_v17 }
  0x2a   :  { %133 = vmatpush.msra.mxu1 %v102_v18 }
  0x2c   :  { %134 = vmatpush.msra.mxu1 %v101_v19 }
  0x2e   :  { %135 = vmatpush.msra.mxu1 %v100_v20 }
  0x93   :  { %v96_v22 = vpop.f32.mrf.mxu0 }
  0x94   :  { %v97_v23 = vadd.f32 %v167_v21, %v96_v22 }
  0x96   :  { %v99_v24 = vmax.f32 %v97_v23, 0.0 }
  0x98   :  { %136 = vmatmul.f32.vlgmr.msra.gmra.mxu1 %v99_v24 }
 0x115   :  { %v137_v26 = vpop.f32.mrf.mxu1 }
 0x116   :  { %v138_v27 = vadd.f32 %v168_v25, %v137_v26 }
 0x118   :  { %v140_v28 = vmax.f32 %v138_v27, 0.0 }
 0x11a   :  { %141 = vst [vmem:[#allocation8] sm:$0x3] %v140_v28 }
 0x11b   :  { %152 = dma.vmem_to_hbm [thread:$0]  %s148_s12, 32, %s150_s15, [#allocation4]  }
 0x11c   :  { %269 = dma.done.wait [#allocation4], 32  }
 0x11d   :  { %270 = vsyncadd [#allocation4], 4294967264 }
 0x11e   :  { %157 = vsyncpa [#allocation3], 1 }
 0x11f   :  { %158 = vsyncpa [#allocation6], 1 }
 0x120   :  { %159 = vsyncpa [#allocation4], 1 }

</bundles_post_ra>
